<compile_context>
chip_gen: v5e
topology: v5e:2x2
jax: 0.10.0
libtpu: 0.0.40
codegen_flags: <defaults>
</compile_context>

<pallas_src>
import math
import numpy as np

import jax
import jax.numpy as jnp
from jax.experimental import pallas as pl
from jax.experimental.pallas import tpu as pltpu


def _pick_tile_n(n):
    """Largest tile in {512, 256, 128} dividing n, else full n (block == full dim)."""
    for t in (512, 256, 128):
        if n % t == 0:
            return t
    return n


def spherical_conv(x, adj, weight):
    """Pallas TPU implementation. Returns (B, out_channels, N) like the PyTorch module."""
    B, N, C = x.shape
    k = adj.shape[-1]
    km1 = k - 1
    O = weight.shape[0]
    assert weight.shape[1] == C and weight.shape[2] == 1, (
        "kernel_size must be 1 (the reference forward only type-checks then)")
    assert km1 >= 1

    TILE_N = _pick_tile_n(N)
    n_tiles = N // TILE_N

    # ---- wrapper-side layout glue (inputs only; output needs no transpose) ----
    x_t = jnp.transpose(x, (0, 2, 1)).astype(jnp.float32)            # (B, C, N)
    idx = jnp.transpose(adj[:, :, 1:], (0, 2, 1)).astype(jnp.int32)  # (B, k-1, N) lane-dense
    # Fold the 1/sqrt(2) of ||(diff, ||diff||)|| = sqrt(2)*||diff|| into the weight once.
    w_scaled = (weight[:, :, 0].astype(jnp.float32) *
                jnp.float32(1.0 / math.sqrt(2.0)))                   # (O, C)

    def kernel(idx_ref, xf_ref, xc_ref, w_ref, o_ref):
        # idx_ref: (1, k-1, TILE_N) int32   lane-dense neighbor indices for this tile
        # xf_ref:  (1, C, N)        f32     full point set (resident across N tiles)
        # xc_ref:  (1, C, TILE_N)   f32     center points of this tile
        # w_ref:   (O, C)           f32     weight, pre-scaled by 1/sqrt(2)
        # o_ref:   (1, O, TILE_N)   f32     output tile, PyTorch (B, O, N) layout
        x_all = xf_ref[0]                       # (C, N)
        x_ctr = xc_ref[0]                       # (C, TILE_N)
        w = w_ref[...]                          # (O, C)
        # Hoisted out of the neighbor loop (JAX does not CSE broadcast/iota).
        row_ids = jax.lax.broadcasted_iota(jnp.int32, (N, TILE_N), 0)

        def body(j, pooled):
            idx_j = idx_ref[0, pl.ds(j, 1), :]                         # (1, TILE_N)
            # Transposed one-hot gather on the MXU: knn_t[:, n] = x_all[:, idx_j[n]]
            onehot = (row_ids == idx_j).astype(jnp.float32)            # (N, TILE_N)
            knn_t = jnp.dot(x_all, onehot,
                            preferred_element_type=jnp.float32)        # (C, TILE_N)
            diff = knn_t - x_ctr                                       # (C, TILE_N)
            sq = jnp.sum(diff * diff, axis=0, keepdims=True)           # (1, TILE_N)
            # pre = (W/sqrt(2)) @ (diff * rsqrt(sq))  ==  (W @ diff) * rsqrt(sq) / sqrt(2)
            pre = jnp.dot(w, diff,
                          preferred_element_type=jnp.float32) * jax.lax.rsqrt(sq)
            return jnp.maximum(pooled, pre)                            # max-pool over j

        init = jnp.full((O, TILE_N), -jnp.inf, dtype=jnp.float32)
        pooled = jax.lax.fori_loop(0, km1, body, init, unroll=(km1 <= 8))
        # ReLU once after the max (monotone, commutes with max over neighbors).
        o_ref[0] = jnp.maximum(pooled, 0.0)

    # Per-step VMEM working set estimate (bytes), used to set the scoped limit.
    per_step = 4 * (
        2 * C * N                    # resident full x (+ headroom)
        + 2 * km1 * TILE_N           # idx block (double-buffered)
        + 2 * C * TILE_N             # center tile
        + 2 * O * TILE_N             # output block
        + 2 * N * TILE_N             # iota + one-hot
        + 4 * (C + O + 1) * TILE_N   # knn/diff/pre/pooled/sq temporaries
    )
    vmem_limit = max(16 << 20, min(int(1.5 * per_step) + (1 << 20), 48 << 20))

    out = pl.pallas_call(
        kernel,
        out_shape=jax.ShapeDtypeStruct((B, O, N), jnp.float32),
        grid=(B, n_tiles),
        in_specs=[
            pl.BlockSpec((1, km1, TILE_N), lambda b, t: (b, 0, t)),   # indices
            pl.BlockSpec((1, C, N),        lambda b, t: (b, 0, 0)),   # full x (resident)
            pl.BlockSpec((1, C, TILE_N),   lambda b, t: (b, 0, t)),   # center tile
            pl.BlockSpec((O, C),           lambda b, t: (0, 0)),      # weight
        ],
        out_specs=pl.BlockSpec((1, O, TILE_N), lambda b, t: (b, 0, t)),
        compiler_params=pltpu.CompilerParams(
            dimension_semantics=("parallel", "parallel"),
            vmem_limit_bytes=vmem_limit,
        ),
    )(idx, x_t, x_t, w_scaled)

    return out  # already (B, out_channels, N)


def spherical_conv_ref(x, adj, weight):
    """Plain-JAX reference of the intended forward semantics (for verification)."""
    B, N, C = x.shape
    knn_idx = adj[:, :, 1:]                                   # (B, N, k-1)
    b_idx = jnp.arange(B)[:, None, None]
    knn = x[b_idx, knn_idx]                                   # (B, N, k-1, C)
    diff = knn - x[:, :, None, :]
    norm = jnp.linalg.norm(diff, axis=-1, keepdims=True)
    frame = jnp.concatenate([diff, norm], axis=-1)
    frame = frame / jnp.linalg.norm(frame, axis=-1, keepdims=True)
    proj = 1.0 * frame[..., :-1]                              # (B, N, k-1, C)
    w0 = weight[:, :, 0]                                      # (O, C)
    pre = jnp.einsum('bnjc,oc->bonj', proj, w0)               # (B, O, N, k-1)
    act = jax.nn.relu(pre)
    return jnp.max(act, axis=-1)                              # (B, O, N)


if __name__ == "__main__":
    key = jax.random.PRNGKey(0)
    B, N = 2, 16                 # batch, num_points
    C, O = 4, 8                  # in_channels, out_channels
    kernel_size = 1
    k = 4                        # adjacency list width (self + k-1 neighbors)

    kx, ka, kw = jax.random.split(key, 3)
    x = jax.random.normal(kx, (B, N, C), dtype=jnp.float32)

    # adjacency: column 0 = self, neighbors = (n + random nonzero offset) % N
    base = jnp.arange(N, dtype=jnp.int32)[None, :, None]                 # (1, N, 1)
    offsets = jax.random.randint(ka, (B, N, k - 1), 1, N, dtype=jnp.int32)
    neigh = (jnp.broadcast_to(base, (B, N, k - 1)) + offsets) % N
    adj = jnp.concatenate([jnp.broadcast_to(base, (B, N, 1)), neigh], axis=-1)
    adj = adj.astype(jnp.int32)

    # kaiming_uniform_(a=sqrt(5)) on (O, C, K): U(-1/sqrt(fan_in), 1/sqrt(fan_in)),
    # fan_in = C * kernel_size
    bound = 1.0 / math.sqrt(C * kernel_size)
    weight = jax.random.uniform(kw, (O, C, kernel_size), jnp.float32, -bound, bound)

    out = spherical_conv(x, adj, weight)
    out = jax.block_until_ready(out)

    ref = spherical_conv_ref(x, adj, weight)
    assert out.shape == (B, O, N), out.shape
    np.testing.assert_allclose(np.asarray(out), np.asarray(ref), rtol=1e-5, atol=1e-5)
    print("KERNEL_OK")
</pallas_src>

<mosaic_0001>
module attributes {stable_mosaic.version = 11 : i64} {
  func.func @kernel(%arg0: i32, %arg1: i32, %arg2: memref<1x3x16xi32, #tpu.memory_space<vmem>>, %arg3: memref<1x4x16xf32, #tpu.memory_space<vmem>>, %arg4: memref<1x4x16xf32, #tpu.memory_space<vmem>>, %arg5: memref<8x4xf32, #tpu.memory_space<vmem>>, %arg6: memref<1x8x16xf32, #tpu.memory_space<vmem>>) attributes {dimension_semantics = [#tpu.dimension_semantics<parallel>, #tpu.dimension_semantics<parallel>], iteration_bounds = array<i64: 2, 1>, scalar_prefetch = 0 : i64, scratch_operands = 0 : i64, tpu.core_type = #tpu.core_type<tc>, window_params = [{transform_indices = @transform_0, window_bounds = array<i64: 1, 3, 16>}, {transform_indices = @transform_1, window_bounds = array<i64: 1, 4, 16>}, {transform_indices = @transform_2, window_bounds = array<i64: 1, 4, 16>}, {pipeline_mode = #tpu.pipeline_mode<synchronous>, transform_indices = @transform_3, window_bounds = array<i64: 8, 4>}, {transform_indices = @transform_4, window_bounds = array<i64: 1, 8, 16>}]} {
    %c0 = arith.constant 0 : index
    %c0_0 = arith.constant 0 : index
    %c0_1 = arith.constant 0 : index
    %0 = vector.load %arg3[%c0, %c0_0, %c0_1] : memref<1x4x16xf32, #tpu.memory_space<vmem>>, vector<1x4x16xf32>
    %1 = vector.shape_cast %0 : vector<1x4x16xf32> to vector<4x16xf32>
    %c0_2 = arith.constant 0 : index
    %c0_3 = arith.constant 0 : index
    %c0_4 = arith.constant 0 : index
    %2 = vector.load %arg4[%c0_2, %c0_3, %c0_4] : memref<1x4x16xf32, #tpu.memory_space<vmem>>, vector<1x4x16xf32>
    %3 = vector.shape_cast %2 : vector<1x4x16xf32> to vector<4x16xf32>
    %c0_5 = arith.constant 0 : index
    %c0_6 = arith.constant 0 : index
    %4 = vector.load %arg5[%c0_5, %c0_6] : memref<8x4xf32, #tpu.memory_space<vmem>>, vector<8x4xf32>
    %5 = tpu.iota {dimensions = array<i32: 0>} : vector<16x16xi32>
    %cst = arith.constant 0xFF800000 : f32
    %6 = vector.broadcast %cst : f32 to vector<8x16xf32>
    %c0_i32 = arith.constant 0 : i32
    %c0_7 = arith.constant 0 : index
    %7 = arith.index_cast %c0_i32 : i32 to index
    %c0_8 = arith.constant 0 : index
    %8 = vector.load %arg2[%c0_7, %7, %c0_8] : memref<1x3x16xi32, #tpu.memory_space<vmem>>, vector<1x1x16xi32>
    %9 = vector.shape_cast %8 : vector<1x1x16xi32> to vector<1x16xi32>
    %10 = vector.broadcast %9 : vector<1x16xi32> to vector<16x16xi32>
    %11 = arith.cmpi eq, %5, %10 : vector<16x16xi32>
    %12 = arith.extui %11 : vector<16x16xi1> to vector<16x16xi32>
    %13 = arith.sitofp %12 : vector<16x16xi32> to vector<16x16xf32>
    %cst_9 = arith.constant dense<0.000000e+00> : vector<4x16xf32>
    %14 = tpu.matmul %1, %13, %cst_9 {dimension_numbers = #tpu.dot_dimension_numbers<[1], [0], [0], [1], [0, 0, 1, 1], [], []>} : vector<4x16xf32>, vector<16x16xf32>, vector<4x16xf32> -> vector<4x16xf32>
    %15 = arith.subf %14, %3 : vector<4x16xf32>
    %16 = arith.mulf %15, %15 : vector<4x16xf32>
    %cst_10 = arith.constant dense<0.000000e+00> : vector<16xf32>
    %17 = vector.multi_reduction <add>, %16, %cst_10 [0] : vector<4x16xf32> to vector<16xf32>
    %18 = vector.shape_cast %17 : vector<16xf32> to vector<1x16xf32>
    %cst_11 = arith.constant dense<0.000000e+00> : vector<8x16xf32>
    %19 = tpu.matmul %4, %15, %cst_11 {dimension_numbers = #tpu.dot_dimension_numbers<[1], [0], [0], [1], [0, 0, 1, 1], [], []>} : vector<8x4xf32>, vector<4x16xf32>, vector<8x16xf32> -> vector<8x16xf32>
    %20 = math.rsqrt %18 : vector<1x16xf32>
    %21 = vector.broadcast %20 : vector<1x16xf32> to vector<8x16xf32>
    %22 = arith.mulf %19, %21 : vector<8x16xf32>
    %23 = arith.maximumf %6, %22 : vector<8x16xf32>
    %c1_i32 = arith.constant 1 : i32
    %c0_12 = arith.constant 0 : index
    %24 = arith.index_cast %c1_i32 : i32 to index
    %c0_13 = arith.constant 0 : index
    %25 = vector.load %arg2[%c0_12, %24, %c0_13] : memref<1x3x16xi32, #tpu.memory_space<vmem>>, vector<1x1x16xi32>
    %26 = vector.shape_cast %25 : vector<1x1x16xi32> to vector<1x16xi32>
    %27 = vector.broadcast %26 : vector<1x16xi32> to vector<16x16xi32>
    %28 = arith.cmpi eq, %5, %27 : vector<16x16xi32>
    %29 = arith.extui %28 : vector<16x16xi1> to vector<16x16xi32>
    %30 = arith.sitofp %29 : vector<16x16xi32> to vector<16x16xf32>
    %cst_14 = arith.constant dense<0.000000e+00> : vector<4x16xf32>
    %31 = tpu.matmul %1, %30, %cst_14 {dimension_numbers = #tpu.dot_dimension_numbers<[1], [0], [0], [1], [0, 0, 1, 1], [], []>} : vector<4x16xf32>, vector<16x16xf32>, vector<4x16xf32> -> vector<4x16xf32>
    %32 = arith.subf %31, %3 : vector<4x16xf32>
    %33 = arith.mulf %32, %32 : vector<4x16xf32>
    %cst_15 = arith.constant dense<0.000000e+00> : vector<16xf32>
    %34 = vector.multi_reduction <add>, %33, %cst_15 [0] : vector<4x16xf32> to vector<16xf32>
    %35 = vector.shape_cast %34 : vector<16xf32> to vector<1x16xf32>
    %cst_16 = arith.constant dense<0.000000e+00> : vector<8x16xf32>
    %36 = tpu.matmul %4, %32, %cst_16 {dimension_numbers = #tpu.dot_dimension_numbers<[1], [0], [0], [1], [0, 0, 1, 1], [], []>} : vector<8x4xf32>, vector<4x16xf32>, vector<8x16xf32> -> vector<8x16xf32>
    %37 = math.rsqrt %35 : vector<1x16xf32>
    %38 = vector.broadcast %37 : vector<1x16xf32> to vector<8x16xf32>
    %39 = arith.mulf %36, %38 : vector<8x16xf32>
    %40 = arith.maximumf %23, %39 : vector<8x16xf32>
    %c2_i32 = arith.constant 2 : i32
    %c0_17 = arith.constant 0 : index
    %41 = arith.index_cast %c2_i32 : i32 to index
    %c0_18 = arith.constant 0 : index
    %42 = vector.load %arg2[%c0_17, %41, %c0_18] : memref<1x3x16xi32, #tpu.memory_space<vmem>>, vector<1x1x16xi32>
    %43 = vector.shape_cast %42 : vector<1x1x16xi32> to vector<1x16xi32>
    %44 = vector.broadcast %43 : vector<1x16xi32> to vector<16x16xi32>
    %45 = arith.cmpi eq, %5, %44 : vector<16x16xi32>
    %46 = arith.extui %45 : vector<16x16xi1> to vector<16x16xi32>
    %47 = arith.sitofp %46 : vector<16x16xi32> to vector<16x16xf32>
    %cst_19 = arith.constant dense<0.000000e+00> : vector<4x16xf32>
    %48 = tpu.matmul %1, %47, %cst_19 {dimension_numbers = #tpu.dot_dimension_numbers<[1], [0], [0], [1], [0, 0, 1, 1], [], []>} : vector<4x16xf32>, vector<16x16xf32>, vector<4x16xf32> -> vector<4x16xf32>
    %49 = arith.subf %48, %3 : vector<4x16xf32>
    %50 = arith.mulf %49, %49 : vector<4x16xf32>
    %cst_20 = arith.constant dense<0.000000e+00> : vector<16xf32>
    %51 = vector.multi_reduction <add>, %50, %cst_20 [0] : vector<4x16xf32> to vector<16xf32>
    %52 = vector.shape_cast %51 : vector<16xf32> to vector<1x16xf32>
    %cst_21 = arith.constant dense<0.000000e+00> : vector<8x16xf32>
    %53 = tpu.matmul %4, %49, %cst_21 {dimension_numbers = #tpu.dot_dimension_numbers<[1], [0], [0], [1], [0, 0, 1, 1], [], []>} : vector<8x4xf32>, vector<4x16xf32>, vector<8x16xf32> -> vector<8x16xf32>
    %54 = math.rsqrt %52 : vector<1x16xf32>
    %55 = vector.broadcast %54 : vector<1x16xf32> to vector<8x16xf32>
    %56 = arith.mulf %53, %55 : vector<8x16xf32>
    %57 = arith.maximumf %40, %56 : vector<8x16xf32>
    %c3_i32 = arith.constant 3 : i32
    %cst_22 = arith.constant 0.000000e+00 : f32
    %58 = vector.broadcast %cst_22 : f32 to vector<8x16xf32>
    %59 = arith.maximumf %57, %58 : vector<8x16xf32>
    %c0_23 = arith.constant 0 : index
    %c0_24 = arith.constant 0 : index
    %c0_25 = arith.constant 0 : index
    %60 = vector.load %arg6[%c0_23, %c0_24, %c0_25] : memref<1x8x16xf32, #tpu.memory_space<vmem>>, vector<1x8x16xf32>
    %61 = vector.shape_cast %60 : vector<1x8x16xf32> to vector<8x16xf32>
    %62 = vector.shape_cast %59 : vector<8x16xf32> to vector<1x8x16xf32>
    tpu.vector_store %arg6[%c0_23, %c0_24, %c0_25], %62 {strides = array<i32>} : memref<1x8x16xf32, #tpu.memory_space<vmem>>, vector<1x8x16xf32>,
    return
  }
  func.func @transform_0(%arg0: i32, %arg1: i32) -> (i32, i32, i32) {
    %c0_i32 = arith.constant 0 : i32
    %c0_i32_0 = arith.constant 0 : i32
    return %arg0, %c0_i32, %arg1 : i32, i32, i32
  }
  func.func @transform_1(%arg0: i32, %arg1: i32) -> (i32, i32, i32) {
    %c0_i32 = arith.constant 0 : i32
    %c0_i32_0 = arith.constant 0 : i32
    %c0_i32_1 = arith.constant 0 : i32
    return %arg0, %c0_i32, %c0_i32_0 : i32, i32, i32
  }
  func.func @transform_2(%arg0: i32, %arg1: i32) -> (i32, i32, i32) {
    %c0_i32 = arith.constant 0 : i32
    %c0_i32_0 = arith.constant 0 : i32
    return %arg0, %c0_i32, %arg1 : i32, i32, i32
  }
  func.func @transform_3(%arg0: i32, %arg1: i32) -> (i32, i32) {
    %c0_i32 = arith.constant 0 : i32
    %c0_i32_0 = arith.constant 0 : i32
    %c0_i32_1 = arith.constant 0 : i32
    return %c0_i32, %c0_i32_0 : i32, i32
  }
  func.func @transform_4(%arg0: i32, %arg1: i32) -> (i32, i32, i32) {
    %c0_i32 = arith.constant 0 : i32
    %c0_i32_0 = arith.constant 0 : i32
    return %arg0, %c0_i32, %arg1 : i32, i32, i32
  }
}

</mosaic_0001>

<bundles_post_ra>
// kernel: tpu_custom_call.1
= control target key start
LH: loop header
LB: loop body
LE: loop exit
PB: predicated region body
PF: predicated region fallthrough
CT: control target
= control target key end

     0   :  { %9 = vsyncpa [#allocation3], 0  ;;  %s935_s0 = inlined_call_operand.vmem [shape: s32[2,3,16], index: 0, kind: input, shape index: {}]   ;;  %s936_s1 = inlined_call_operand.vmem [shape: f32[2,4,16], index: 1, kind: input, shape index: {}]   ;;  %s937_s2 = inlined_call_operand.vmem [shape: f32[2,4,16], index: 2, kind: input, shape index: {}]   ;;  %s938_s3 = inlined_call_operand.vmem [shape: f32[8,4], index: 3, kind: input, shape index: {}]   ;;  %s939_s4 = inlined_call_operand.hbm [shape: f32[2,8,16], index: 4, kind: output, shape index: {}]  }
   0x1   :  { %11 = vsyncpa [#allocation3 + $0x1], 0  ;;  %s816_s15 = smov 0   ;;  %s818_s16 = smov 0  }
   0x2   :  { %s820_s17 = smov 0   ;;  %s822_s18 = smov 0  }
   0x3   :  { %s824_s19 = smov 0   ;;  %s826_s20 = smov 0  }
   0x4 LB: > { %s611_s21 = sadd.s32 4294967295, %s788_s20   ;;  %s612_s22 = sadd.s32 4294967294, %s788_s20   ;;  %s788_s20 = sphi %s826_s20, %s17_s20   ;;  %s784_s19 = sphi %s824_s19, %s946_s19   ;;  %s780_s18 = sphi %s822_s18, %s945_s18   ;;  %s776_s17 = sphi %s820_s17, %s944_s17   ;;  %s772_s16 = sphi %s818_s16, %s943_s16   ;;  %s768_s15 = sphi %s816_s15, %s942_s15  }
   0x5   : > { %s29_s23 = sadd.s32 1, %s784_s19  ;;  %s141_s24 = sadd.s32 1, %s776_s17 }
   0x6   : > { %p31_p0 = scmp.ge.s32.totalorder %s29_s23, 2  ;;  %p151_p1 = scmp.ne.s32.totalorder %s776_s17, %s772_s16 }
   0x7   : > { %p152_p2 = scmp.eq.s32.totalorder %s611_s21, 1  ;;  %p157_p3 = scmp.ne.s32.totalorder %s772_s16, %s768_s15 }
   0x8   : > { %s948_s23 = smov (%p31_p0, %s29_s23), 0  ;;  %p158_p5 = scmp.eq.s32.totalorder %s612_s22, 1 }
   0x9   : > { %p856_p4 = por %p152_p2, %p151_p1  ;;  %s136_s26 = ssub.s32 %s784_s19, %s948_s23 }
   0xa   : > { %p615_p6 = scmp.ge.s32.totalorder %s788_s20, 1  ;;  %p139_p7 = scmp.eq.s32.totalorder %s136_s26, 0 }
   0xb   : > { %p863_p8 = por %p158_p5, %p157_p3  ;;  %p206_p9 = scmp.lt.s32.totalorder %s788_s20, 3 }
   0xc   : > { %s869_s28 = scalar_select %p139_p7, %s776_s17, %s141_s24  }
   0xd   : > { %p207_p10 = pnand %p615_p6, %p206_p9 }
   0xe   : > { %p245_p11 = scmp.lt.s32.totalorder (!%p207_p10), %s780_s18, 1  ;;  %s242_s22 = sand.u32 (!%p207_p10), 1, %s772_s16  }
   0xf   : > { %210 = sbr.rel (%p207_p10) target bundleno = 437 (0x1b5), region = 36  ;;  %s616_s24 = sshll.u32 (!%p207_p10), %s242_s22, 3 }
  0x10   : > { %s642_s26 = sshll.u32 (!%p207_p10), %s780_s18, 3  ;;  %s244_s6 = scalar_lea.vmem (!%p207_p10), [#allocation2], %s616_s24 }
  0x11   : > { %s508_s5 = scalar_lea.hbm (!%p207_p10), %s939_s4, %s642_s26 }
  0x12   : > { %s512_s8 = sshll.u32 (!%p207_p10), %s508_s5, 4  ;;  %s513_s8 = int_to_ptr.hbm [resolvable:$true] %s512_s8 }
  0x13   : > { %s724_s9 = sshra.s32 (!%p207_p10), %s513_s8, 4  ;;  %s725_s9 = int_to_ptr.hbm [resolvable:$true] %s724_s9 }
  0x14   : > { %v266_v0 = vlaneseq  ;;  %s246_s29 = scalar_select %p245_p11, %s780_s18, 1  ;;  %v790_v5 = vmov 1.0   ;;  %vm277_vm4 = vcmask 130048   ;;  %vm315_vm5 = vcmask 1043456   ;;  %v265_v11 = vld [vmem:[%s938_s3] sm:$0xff] }
  0x15   : > { %vm311_vm6 = vcmask 31744   ;;  %vm303_vm9 = vcmask 125952   ;;  %s497_s18 = scalar_lea.sflag [#allocation3], %s242_s22  ;;  %p731_p1 = scmp.lt.s32.totalorder %s725_s9, %s939_s4 }
  0x16   : > { %v267_v1 = vshrl.u32 %v266_v0, 7  ;;  %s617_s30 = sshll.u32 %s246_s29, 2 }
  0x17   : > { %s251_s7 = scalar_lea.vmem %s935_s0, %s617_s30  ;;  %s255_s10 = scalar_lea.vmem %s936_s1, %s617_s30 }
  0x18   : > { %v268_v2 = vadd.s32 8, %v267_v1  ;;  %v701_v3 = vld [vmem:[%s251_s7] ss:$0 sm:$0xff]  ;;  %v702_v4 = vld [vmem:[%s251_s7 + $0x1] ss:$0 sm:$0xff]  ;;  %s262_s13 = scalar_lea.vmem %s937_s2, %s617_s30 }
  0x19   : > { %vm271_vm1 = vcmp.eq.s32.totalorder %v267_v1, %v701_v3  ;;  %vm352_vm3 = vcmp.eq.s32.totalorder %v267_v1, %v702_v4  ;;  %v263_v6 = vld [vmem:[%s255_s10] sm:$0xf]  ;;  %s726_s10 = scalar_lea.hbm %s725_s9, 8 }
  0x1a   : > { %vm272_vm0 = vcmp.eq.s32.totalorder %v268_v2, %v701_v3  ;;  %vm353_vm2 = vcmp.eq.s32.totalorder %v268_v2, %v702_v4  ;;  %v264_v7 = vld [vmem:[%s262_s13] sm:$0xf]  ;;  %p727_p12 = scmp.ne.s32.totalorder %s725_s9, %s726_s10  ;;  %s730_s13 = scalar_lea.hbm %s939_s4, 16 }
  0x1b   : > { %622 = vmatpush.msk.msra.mxu0 %vm272_vm0, %v790_v5  ;;  %629 = vmatpush.msk.msra.mxu2 %vm353_vm2, %v790_v5  ;;  %v703_v8 = vld [vmem:[%s251_s7 + $0x2] ss:$0 sm:$0xff]  ;;  %s510_s7 = sshll.u32 %s244_s6, 4  ;;  %p732_p2 = scmp.lt.s32.totalorder %s730_s13, %s726_s10  ;;  %s511_s7 = int_to_ptr.vmem [resolvable:$true] %s510_s7 }
  0x1c   : > { %vm425_vm7 = vcmp.eq.s32.totalorder %v268_v2, %v703_v8  ;;  %vm424_vm8 = vcmp.eq.s32.totalorder %v267_v1, %v703_v8  ;;  %p728_p13 = pnand %p727_p12, %p856_p4 }
  0x1d   : > { %623 = vmatpush.msk.msra.mxu0 %vm271_vm1, %v790_v5  ;;  %630 = vmatpush.msk.msra.mxu2 %vm352_vm3, %v790_v5  ;;  %p733_p3 = por %p732_p2, %p731_p1 }
  0x1e   : > { %624 = vmatmul.msk.f32.vlgmr.msra.gmra.mxu0 %vm277_vm4, %v263_v6  ;;  %631 = vmatmul.msk.f32.vlgmr.msra.gmra.mxu2 %vm277_vm4, %v263_v6  ;;  %p729_p0 = pneg %p728_p13 }
  0x20   : > { %p734_p5 = pnand %p733_p3, %p729_p0 }
  0x9b   : > { %v298_v9 = vpop.f32.mrf.mxu0 }
  0x9c   : > { %v301_v10 = vsub.f32 %v298_v9, %v264_v7 }
  0x9e   : > { %625 = vmatpush.msk.msra.mxu1 %vm315_vm5, %v301_v10  ;;  %v302_v14 = vmul.f32 %v301_v10, %v301_v10 }
  0x9f   : > { %626 = vmatmul.msk.f32.vlgmr.msra.gmra.mxu1 %vm311_vm6, %v265_v11 }
  0xa0   : > { %636 = vmatpush.msk.msrb.mxu1 %vm425_vm7, %v790_v5  ;;  %v304_v15 = vsel %vm303_vm9, %v302_v14, 0.0 }
  0xa1   : > { %v375_v12 = vpop.f32.mrf.mxu2  ;;  %v305_v16 = vrot.slane %v304_v15, 4 }
  0xa2   : > { %637 = vmatpush.msk.msrb.mxu1 %vm424_vm8, %v790_v5  ;;  %v378_v13 = vsub.f32 %v375_v12, %v264_v7 }
  0xa3   : > { %v306_v17 = vadd.f32 %v305_v16, %v304_v15 }
  0xa4   : > { %632 = vmatpush.msk.msra.mxu3 %vm315_vm5, %v378_v13  ;;  %v379_v18 = vmul.f32 %v378_v13, %v378_v13 }
  0xa5   : > { %633 = vmatmul.msk.f32.vlgmr.msra.gmra.mxu3 %vm311_vm6, %v265_v11  ;;  %v307_v19 = vrot.slane %v306_v17, 2 }
  0xa6   : > { %v380_v20 = vsel %vm303_vm9, %v379_v18, 0.0 }
  0xa7   : > { %638 = vmatmul.msk.f32.vlgmr.msrb.gmra.mxu1 %vm277_vm4, %v263_v6  ;;  %v381_v21 = vrot.slane %v380_v20, 4  ;;  %v308_v22 = vadd.f32 %v307_v19, %v306_v17 }
  0xa9   : > { %v382_v23 = vadd.f32 %v381_v21, %v380_v20  ;;  %v309_v24 = vrot.slane %v308_v22, 1 }
  0xab   : > { %v383_v25 = vrot.slane %v382_v23, 2  ;;  %v310_v26 = vadd.f32 %v309_v24, %v308_v22 }
  0xad   : > { %v384_v27 = vadd.f32 %v383_v25, %v382_v23  ;;  %704 = vrsqrt.f32 %v310_v26  ;;  %vm345_vm11 = vweird.f32 %v310_v26 }
  0xaf   : > { %v385_v28 = vrot.slane %v384_v27, 1 }
  0xb1   : > { %v386_v30 = vadd.f32 %v385_v28, %v384_v27 }
  0xb3   : > { %v705_v29 = vpop.eup %704  ;;  %706 = vrsqrt.f32 %v386_v30  ;;  %vm416_vm13 = vweird.f32 %v386_v30 }
  0xb4   : > { %v340_v31 = vmul.f32 %v705_v29, %v310_v26  ;;  %vm346_vm10 = vweird.f32 %v705_v29 }
  0xb5   : > { %vm347_vm12 = vmor %vm345_vm11, %vm346_vm10 }
  0xb6   : > { %v341_v32 = vmul.f32 %v705_v29, %v340_v31 }
  0xb8   : > { %v342_v34 = vmul.f32 0.5, %v341_v32 }
  0xb9   : > { %v707_v33 = vpop.eup %706 }
  0xba   : > { %v411_v35 = vmul.f32 %v707_v33, %v386_v30  ;;  %v343_v36 = vsub.f32 1.5, %v342_v34  ;;  %vm417_vm14 = vweird.f32 %v707_v33 }
  0xbb   : > { %vm418_vm15 = vmor %vm416_vm13, %vm417_vm14 }
  0xbc   : > { %v412_v37 = vmul.f32 %v707_v33, %v411_v35  ;;  %v344_v38 = vmul.f32 %v705_v29, %v343_v36 }
  0xbe   : > { %v413_v39 = vmul.f32 0.5, %v412_v37  ;;  %v348_v41 = vsel %vm347_vm12, %v705_v29, %v344_v38 }
  0xc0   : > { %v414_v43 = vsub.f32 1.5, %v413_v39 }
  0xc2   : > { %v415_v44 = vmul.f32 %v707_v33, %v414_v43 }
  0xc4   : > { %v419_v47 = vsel %vm418_vm15, %v707_v33, %v415_v44 }
 0x11c   : > { %v336_v40 = vpop.f32.mrf.mxu1 }
 0x11d   : > { %v349_v42 = vmul.f32 %v348_v41, %v336_v40 }
 0x124   : > { %v447_v45 = vpop.f32.mrf.mxu1 }
 0x125   : > { %v450_v46 = vsub.f32 %v447_v45, %v264_v7 }
 0x127   : > { %639 = vmatpush.msk.msrb.mxu3 %vm315_vm5, %v450_v46  ;;  %v451_v51 = vmul.f32 %v450_v46, %v450_v46 }
 0x128   : > { %640 = vmatmul.msk.f32.vlgmr.msrb.gmra.mxu3 %vm311_vm6, %v265_v11  ;;  %v407_v48 = vpop.f32.mrf.mxu3 }
 0x129   : > { %v420_v49 = vmul.f32 %v419_v47, %v407_v48  ;;  %v452_v52 = vsel %vm303_vm9, %v451_v51, 0.0 }
 0x12a   : > { %v453_v53 = vrot.slane %v452_v52, 4 }
 0x12b   : > { %v421_v50 = vmax.f32 %v349_v42, %v420_v49 }
 0x12c   : > { %v454_v54 = vadd.f32 %v453_v53, %v452_v52 }
 0x12e   : > { %v455_v55 = vrot.slane %v454_v54, 2 }
 0x130   : > { %v456_v56 = vadd.f32 %v455_v55, %v454_v54 }
 0x132   : > { %v457_v57 = vrot.slane %v456_v56, 1 }
 0x134   : > { %v458_v58 = vadd.f32 %v457_v57, %v456_v56 }
 0x136   : > { %708 = vrsqrt.f32 %v458_v58  ;;  %vm488_vm1 = vweird.f32 %v458_v58 }
 0x13c   : > { %v709_v59 = vpop.eup %708 }
 0x13d   : > { %v483_v60 = vmul.f32 %v709_v59, %v458_v58  ;;  %vm489_vm0 = vweird.f32 %v709_v59 }
 0x13e   : > { %vm490_vm2 = vmor %vm488_vm1, %vm489_vm0 }
 0x13f   : > { %v484_v61 = vmul.f32 %v709_v59, %v483_v60 }
 0x141   : > { %v485_v62 = vmul.f32 0.5, %v484_v61 }
 0x143   : > { %v486_v63 = vsub.f32 1.5, %v485_v62 }
 0x145   : > { %v487_v0 = vmul.f32 %v709_v59, %v486_v63 }
 0x147   : > { %v491_v2 = vsel %vm490_vm2, %v709_v59, %v487_v0 }
 0x1ab   : > { %v479_v1 = vpop.f32.mrf.mxu3 }
 0x1ac   : > { %v492_v3 = vmul.f32 %v491_v2, %v479_v1 }
 0x1ae   : > { %v493_v4 = vmax.f32 %v421_v50, %v492_v3 }
 0x1b0   : > { %v494_v5 = vmax.f32 %v493_v4, 0.0 }
 0x1b2   : > { %495 = vst.msk [vmem:[%s244_s6] sm:$0xff] %vm277_vm4, %v494_v5 }
 0x1b3   : > { %737 = shalt.err (!%p734_p5)
}
 0x1b4   : > { %645 = dma.vmem_to_hbm [thread:$0]  (%p856_p4), %s511_s7, 128, %s513_s8, %s497_s18  }
 0x1b5 PF: > { %p651_p6 = scmp.ge.s32.totalorder %s788_s20, 2  ;;  %s524_s22 = sand.u32 1, %s768_s15  }
 0x1b6   : > { %s525_s24 = scalar_lea.sflag [#allocation3], %s524_s22 }
 0x1b7   : > { %p648_p7 = pnand %p651_p6, %p863_p8 }
 0x1b9   : > { %p649_p9 = pneg %p648_p7 }
 0x1bb   : > { %763 = dma.done.wait (%p649_p9), %s525_s24, 128  }
 0x1bc   : > { %765 = vsyncadd (%p649_p9), %s525_s24, 4294967168  ;;  %s17_s20 = sadd.s32 1, %s788_s20   ;;  %s942_s15 = smov %s772_s16 }
 0x1bd   : > { %p14_p10 = scmp.ge.s32.totalorder %s17_s20, 4   ;;  %s943_s16 = smov %s776_s17 }
 0x1be   : > { %s944_s17 = smov %s869_s28  ;;  %s945_s18 = smov %s784_s19 }
 0x1bf   : > { %s946_s19 = smov %s948_s23  ;;  %16 = sbr.rel (!%p14_p10) target bundleno = 4 (0x4), region = 77 }
 0x1c4   :  { %531 = vsyncpa [#allocation3], 1 }
 0x1c5   :  { %533 = vsyncpa [#allocation3 + $0x1], 1 }

</bundles_post_ra>
